<compile_context>
chip_gen: v6e
topology: v6e:2x2x1
jax: 0.10.0
libtpu: 0.0.40
codegen_flags: <defaults>
</compile_context>

<pallas_src>
import functools

import jax
import jax.numpy as jnp
import numpy as np
from jax.experimental import pallas as pl
from jax.experimental.pallas import tpu as pltpu


def _tv_kernel(x_ref, o_ref, *, c):
    """x_ref: (NB, TH, W*C) VMEM block. o_ref: (1, 1) f32 SMEM partial."""
    xb = x_ref[...]                   # native dtype; diffs in native, square/sum in f32
    _, th, wc = xb.shape

    partial = jnp.float32(0.0)

    if th > 1:
        # H-direction diffs inside this tile (1-row shift along the sublane axis).
        dh = (xb[:, 1:, :] - xb[:, :-1, :]).astype(jnp.float32)
        partial = partial + jnp.sum(dh * dh)

    if wc > c:
        # W-direction diffs: shift by C along the (lane-dense) last axis.
        # Lane index j = w*C + ch, so xb[..., j+C] - xb[..., j] = x[w+1,ch]-x[w,ch]
        # and never crosses an H row (each row owns its own W*C lanes).
        dw = (xb[:, :, c:] - xb[:, :, :wc - c]).astype(jnp.float32)
        partial = partial + jnp.sum(dw * dw)

    o_ref[0, 0] = partial


def _pick_block(B, H, WC, itemsize, target_bytes):
    """Pick (NB batch elems, TH rows) per block: biggest block <= target_bytes."""
    img_bytes = H * WC * itemsize
    if img_bytes <= target_bytes:
        # Whole image(s) per block; fold as many batch elements as fit.
        nb = min(B, max(1, target_bytes // img_bytes))
        while B % nb:
            nb -= 1
        return int(nb), H
    # One image is too big: tile along H. TH must divide H and be a multiple
    # of 8 (sublane tile) to keep the BlockSpec legal without padding/masking.
    for th in range(H, 0, -1):
        if H % th == 0 and th % 8 == 0 and th * WC * itemsize <= target_bytes:
            return 1, th
    # TODO(synk): pathological H (no divisor that is a multiple of 8) falls back
    # to a full-image block; fine for the shapes exercised here.
    return 1, H


def tv_loss(x, *, block_bytes=4 * 1024 * 1024):
    """Pallas TPU implementation of TVLoss.forward. x: (B, H, W, C)."""
    B, H, W, C = x.shape
    WC = W * C
    x3 = x.reshape(B, H, WC)                        # free, contiguous reshape
    itemsize = x3.dtype.itemsize

    NB, TH = _pick_block(B, H, WC, itemsize, block_bytes)
    GB, GT = B // NB, H // TH

    kernel = functools.partial(_tv_kernel, c=C)
    n_elem = B * H * WC

    partials = pl.pallas_call(
        kernel,
        out_shape=jax.ShapeDtypeStruct((GB, GT), jnp.float32),
        grid_spec=pltpu.PrefetchScalarGridSpec(
            num_scalar_prefetch=0,
            grid=(GB, GT),
            in_specs=[pl.BlockSpec((NB, TH, WC), lambda gb, gt: (gb, gt, 0))],
            out_specs=pl.BlockSpec((1, 1), lambda gb, gt: (gb, gt),
                                   memory_space=pltpu.SMEM),
        ),
        compiler_params=pltpu.CompilerParams(
            # Each step writes its own partial -> no cross-step dependency,
            # both axes can be sharded (v7x megacore); harmless on v5e/v6e.
            dimension_semantics=("parallel", "parallel"),
            vmem_limit_bytes=32 * 1024 * 1024,
        ),
        cost_estimate=pl.CostEstimate(
            flops=int(8 * n_elem),
            transcendentals=0,
            bytes_accessed=int(n_elem * itemsize + GB * GT * 4),
        ),
    )(x3)

    total = jnp.sum(partials)

    if GT > 1:
        # H-diffs across H-tile boundaries (row t*TH-1 vs t*TH) are not visible
        # inside any block; add them here. Touches only 2*(GT-1) rows per batch
        # element, a negligible extra HBM pass.
        top = x3[:, TH:H:TH, :]
        bot = x3[:, TH - 1:H - 1:TH, :]
        d = (top - bot).astype(jnp.float32)
        total = total + jnp.sum(d * d)

    return total / B                                # normalization in the wrapper


def tv_loss_ref(x):
    """Pure-JAX reference matching the PyTorch module exactly."""
    B = x.shape[0]
    h_tv = jnp.sum((x[:, 1:, :, :] - x[:, :-1, :, :]) ** 2)
    w_tv = jnp.sum((x[:, :, 1:, :] - x[:, :, :-1, :]) ** 2)
    return (h_tv + w_tv) / B


if __name__ == "__main__":
    key = jax.random.PRNGKey(0)
    k1, k2 = jax.random.split(key)

    # Case 1: small input, whole batch folds into one block (grid = (1, 1)).
    B, H, W, C = 2, 16, 16, 4
    x1 = jax.random.normal(k1, (B, H, W, C), dtype=jnp.float32)
    out1 = jax.block_until_ready(tv_loss(x1))
    ref1 = jax.block_until_ready(tv_loss_ref(x1))
    np.testing.assert_allclose(np.asarray(out1), np.asarray(ref1),
                               rtol=1e-5, atol=1e-5)

    # Case 2: tiny block budget forces H-tiling (grid = (1, 4)), exercising the
    # multi-step grid, SMEM partials and the cross-tile boundary correction.
    x2 = jax.random.normal(k2, (1, 32, 16, 4), dtype=jnp.float32)
    out2 = jax.block_until_ready(tv_loss(x2, block_bytes=2048))
    ref2 = jax.block_until_ready(tv_loss_ref(x2))
    np.testing.assert_allclose(np.asarray(out2), np.asarray(ref2),
                               rtol=1e-5, atol=1e-5)

    print("KERNEL_OK")
</pallas_src>

<mosaic_0001>
module attributes {stable_mosaic.version = 11 : i64} {
  func.func @_tv_kernel(%arg0: i32, %arg1: i32, %arg2: memref<2x16x64xf32, #tpu.memory_space<vmem>>, %arg3: memref<1x1xf32, #tpu.memory_space<smem>>) attributes {dimension_semantics = [#tpu.dimension_semantics<parallel>, #tpu.dimension_semantics<parallel>], iteration_bounds = array<i64: 1, 1>, scalar_prefetch = 0 : i64, scratch_operands = 0 : i64, tpu.core_type = #tpu.core_type<tc>, window_params = [{transform_indices = @transform_0, window_bounds = array<i64: 2, 16, 64>}, {transform_indices = @transform_1, window_bounds = array<i64: 1, 1>}]} {
    %c0 = arith.constant 0 : index
    %c0_0 = arith.constant 0 : index
    %c0_1 = arith.constant 0 : index
    %0 = vector.load %arg2[%c0, %c0_0, %c0_1] : memref<2x16x64xf32, #tpu.memory_space<vmem>>, vector<2x16x64xf32>
    %1 = vector.extract_strided_slice %0 {offsets = [0, 1, 0], sizes = [2, 15, 64], strides = [1, 1, 1]} : vector<2x16x64xf32> to vector<2x15x64xf32>
    %2 = vector.extract_strided_slice %0 {offsets = [0, 0, 0], sizes = [2, 15, 64], strides = [1, 1, 1]} : vector<2x16x64xf32> to vector<2x15x64xf32>
    %3 = arith.subf %1, %2 : vector<2x15x64xf32>
    %4 = arith.mulf %3, %3 : vector<2x15x64xf32>
    %5 = vector.shape_cast %4 : vector<2x15x64xf32> to vector<1x2x15x64xf32>
    %cst = arith.constant dense<0.000000e+00> : vector<1xf32>
    %6 = vector.multi_reduction <add>, %5, %cst [1, 2, 3] : vector<1x2x15x64xf32> to vector<1xf32>
    %7 = vector.shape_cast %6 : vector<1xf32> to vector<1x1x1x1xf32>
    %8 = vector.extract %7[0, 0, 0, 0] : f32 from vector<1x1x1x1xf32>
    %cst_2 = arith.constant 0.000000e+00 : f32
    %9 = arith.addf %cst_2, %8 : f32
    %10 = vector.extract_strided_slice %0 {offsets = [0, 0, 4], sizes = [2, 16, 60], strides = [1, 1, 1]} : vector<2x16x64xf32> to vector<2x16x60xf32>
    %11 = vector.extract_strided_slice %0 {offsets = [0, 0, 0], sizes = [2, 16, 60], strides = [1, 1, 1]} : vector<2x16x64xf32> to vector<2x16x60xf32>
    %12 = arith.subf %10, %11 : vector<2x16x60xf32>
    %13 = arith.mulf %12, %12 : vector<2x16x60xf32>
    %14 = vector.shape_cast %13 : vector<2x16x60xf32> to vector<1x2x16x60xf32>
    %cst_3 = arith.constant dense<0.000000e+00> : vector<1xf32>
    %15 = vector.multi_reduction <add>, %14, %cst_3 [1, 2, 3] : vector<1x2x16x60xf32> to vector<1xf32>
    %16 = vector.shape_cast %15 : vector<1xf32> to vector<1x1x1x1xf32>
    %17 = vector.extract %16[0, 0, 0, 0] : f32 from vector<1x1x1x1xf32>
    %18 = arith.addf %9, %17 : f32
    %c0_4 = arith.constant 0 : index
    %c0_5 = arith.constant 0 : index
    %19 = memref.load %arg3[%c0_4, %c0_5] : memref<1x1xf32, #tpu.memory_space<smem>>
    memref.store %18, %arg3[%c0_4, %c0_5] : memref<1x1xf32, #tpu.memory_space<smem>>
    return
  }
  func.func @transform_0(%arg0: i32, %arg1: i32) -> (i32, i32, i32) {
    %c0_i32 = arith.constant 0 : i32
    %c0_i32_0 = arith.constant 0 : i32
    return %arg0, %arg1, %c0_i32 : i32, i32, i32
  }
  func.func @transform_1(%arg0: i32, %arg1: i32) -> (i32, i32) {
    %c0_i32 = arith.constant 0 : i32
    return %arg0, %arg1 : i32, i32
  }
}

</mosaic_0001>

<bundles_post_ra>
// kernel: tpu_custom_call.1
= control target key start
LH: loop header
LB: loop body
LE: loop exit
PB: predicated region body
PF: predicated region fallthrough
CT: control target
= control target key end

     0   :  { %6 = vsyncpa [#allocation3], 0  ;;  %s218_s0 = inlined_call_operand.hbm [shape: f32[2,16,64], index: 0, kind: input, shape index: {}]   ;;  %s219_s1 = inlined_call_operand.hbm [shape: f32[1,1], index: 1, kind: output, shape index: {}]  }
   0x1   :  { %7 = vsyncpa [#allocation4], 0  ;;  %s196_s6 = smov [#allocation2]  }
   0x2   :  { %s13_s7 = sshll.u32 %s196_s6, 4  ;;  %s14_s7 = int_to_ptr.vmem [resolvable:$true] %s13_s7 }
   0x3   :  { %s172_s8 = scalar_lea.vmem %s14_s7, 512  ;;  %p177_p1 = scmp.lt.s32.totalorder %s14_s7, %s14_s7 }
   0x4   :  { %p173_p0 = scmp.ne.s32.totalorder %s14_s7, %s172_s8  ;;  %p178_p2 = scmp.lt.s32.totalorder %s172_s8, %s172_s8 }
   0x6   :  { %p179_p3 = por %p178_p2, %p177_p1 }
   0x8   :  { %p180_p4 = pnand %p179_p3, %p173_p0 }
   0xa   :  { %183 = shalt.err (!%p180_p4)
}
   0xb   :  { %s197_s9 = smov 128   ;;  %s198_s10 = smov 8  }
   0xc   :  { %19 = dma.hbm_to_vmem [thread:$0]  %s218_s0, 512, %s14_s7, [#allocation3], %s197_s9, %s197_s9, %s198_s10  }
   0xd   :  { %192 = dma.done.wait [#allocation3], 512  }
   0xe   :  { %193 = vsyncadd [#allocation3], 4294966784  ;;  %v23_v0 = vld [vmem:[#allocation2] sm:$0xff]  ;;  %v25_v1 = vld [vmem:[#allocation2 + $0x10] sm:$0xff]  ;;  %s199_s13 = smov 4   ;;  %vm31_vm0 = vcmask 1040384  }
   0xf   :  { %84 = vrot.lane.b32.xlu0 %v23_v0, %s199_s13  ;;  %88 = vrot.lane.b32.xlu1 %v25_v1, %s199_s13  ;;  %v24_v2 = vld [vmem:[#allocation2 + $0x8] sm:$0xff]  ;;  %v26_v3 = vld [vmem:[#allocation2 + $0x18] sm:$0xff]  ;;  %v32_v8 = vrot.slane %v23_v0, 7  ;;  %s200_s0 = smov 124   ;;  %v35_v16 = vrot.slane %v25_v1, 7  ;;  %vm54_vm1 = vcmask 1046528  }
  0x10   :  { %v33_v9 = vrot.slane %v24_v2, 7  ;;  %v36_v17 = vrot.slane %v26_v3, 7  ;;  %vm65_vm2 = vcmask 523264   ;;  %vm67_vm3 = vcmask 522240   ;;  %s201_s17 = smov [#allocation5]  }
  0x11   :  { %v42_v21 = vsub.f32 %v23_v0, %v32_v8  ;;  %v44_v24 = vsub.f32 %v25_v1, %v35_v16  ;;  %vm120_vm4 = vcmask 490496  }
  0x12   :  { %v34_v19 = vsel %vm31_vm0, %v32_v8, %v33_v9  ;;  %v37_v23 = vsel %vm31_vm0, %v35_v16, %v36_v17 }
  0x13   :  { %86 = vrot.lane.b32.xlu0 %v24_v2, %s199_s13  ;;  %90 = vrot.lane.b32.xlu1 %v26_v3, %s199_s13  ;;  %v43_v22 = vsub.f32 %v24_v2, %v34_v19  ;;  %v46_v25 = vmul.f32 %v42_v21, %v42_v21  ;;  %v45_v26 = vsub.f32 %v26_v3, %v37_v23 }
  0x14   :  { %v48_v28 = vmul.f32 %v44_v24, %v44_v24 }
  0x15   :  { %v47_v27 = vmul.f32 %v43_v22, %v43_v22  ;;  %v55_v29 = vrot.slane %v46_v25, 1  ;;  %v49_v30 = vmul.f32 %v45_v26, %v45_v26 }
  0x16   :  { %v58_v32 = vrot.slane %v48_v28, 1 }
  0x17   :  { %v56_v31 = vrot.slane %v47_v27, 1  ;;  %v59_v34 = vrot.slane %v49_v30, 1 }
  0x19   :  { %v57_v33 = vsel %vm54_vm1, %v55_v29, %v56_v31  ;;  %v68_v36 = vsel %vm67_vm3, %v56_v31, 0.0  ;;  %v60_v37 = vsel %vm54_vm1, %v58_v32, %v59_v34  ;;  %v72_v41 = vsel %vm67_vm3, %v59_v34, 0.0 }
  0x1a   :  { %v66_v35 = vsel %vm65_vm2, %v57_v33, 0.0  ;;  %v70_v39 = vsel %vm65_vm2, %v60_v37, 0.0 }
  0x1b   :  { %v69_v38 = vadd.f32 %v68_v36, %v66_v35 }
  0x1d   :  { %v71_v40 = vadd.f32 %v70_v39, %v69_v38 }
  0x1f   :  { %v73_v42 = vadd.f32 %v72_v41, %v71_v40 }
  0x81   :  { %v85_v4 = vpop.permute.xlu0 %84  ;;  %v89_v5 = vpop.permute.xlu1 %88 }
  0x82   :  { %v96_v6 = vsub.f32 %v23_v0, %v85_v4  ;;  %v98_v7 = vsub.f32 %v25_v1, %v89_v5 }
  0x84   :  { %v100_v10 = vmul.f32 %v96_v6, %v96_v6  ;;  %v102_v13 = vmul.f32 %v98_v7, %v98_v7 }
  0x85   :  { %v87_v11 = vpop.permute.xlu0 %86  ;;  %v91_v12 = vpop.permute.xlu1 %90 }
  0x86   :  { %v97_v14 = vsub.f32 %v24_v2, %v87_v11  ;;  %108 = vrot.lane.b32.xlu0 %v100_v10, %s200_s0  ;;  %v99_v15 = vsub.f32 %v26_v3, %v91_v12 }
  0x88   :  { %v101_v18 = vmul.f32 %v97_v14, %v97_v14  ;;  %v103_v20 = vmul.f32 %v99_v15, %v99_v15 }
  0x8a   :  { %112 = vrot.lane.b32.xlu0 %v102_v13, %s200_s0  ;;  %110 = vrot.lane.b32.xlu1 %v101_v18, %s200_s0 }
  0x8e   :  { %114 = vrot.lane.b32.xlu1 %v103_v20, %s200_s0 }
  0xa9   :  { %74 = vadd.xlane.f32.xlu0 %v73_v42 }
  0xf8   :  { %v109_v43 = vpop.permute.xlu0 %108 }
  0xf9   :  { %v121_v46 = vsel %vm120_vm4, %v109_v43, 0.0 }
  0xfc   :  { %v111_v44 = vpop.permute.xlu1 %110  ;;  %v113_v45 = vpop.permute.xlu0 %112 }
  0xfd   :  { %v122_v47 = vsel %vm120_vm4, %v111_v44, 0.0  ;;  %v124_v49 = vsel %vm120_vm4, %v113_v45, 0.0 }
  0xfe   :  { %v123_v48 = vadd.f32 %v122_v47, %v121_v46 }
 0x100   :  { %v125_v50 = vadd.f32 %v124_v49, %v123_v48  ;;  %v115_v51 = vpop.permute.xlu1 %114 }
 0x101   :  { %v126_v52 = vsel %vm120_vm4, %v115_v51, 0.0 }
 0x102   :  { %v127_v53 = vadd.f32 %v126_v52, %v125_v50 }
 0x104   :  { %128 = vadd.xlane.f32.xlu1 %v127_v53 }
 0x132   :  { %v75_v54 = vpop.xlane.xlu0 %74 }
 0x133   :  { %v76_v55 = vrot.slane %v75_v54, 4 }
 0x135   :  { %v77_v56 = vadd.f32 %v76_v55, %v75_v54 }
 0x137   :  { %v78_v57 = vrot.slane %v77_v56, 2 }
 0x139   :  { %v79_v58 = vadd.f32 %v78_v57, %v77_v56 }
 0x13b   :  { %v80_v59 = vrot.slane %v79_v58, 1 }
 0x13d   :  { %v81_v60 = vadd.f32 %v80_v59, %v79_v58 }
 0x13f   :  { %154 = vpush %v81_v60 }
 0x170   :  { %s155_s14 = spop %154 }
 0x18d   :  { %v129_v61 = vpop.xlane.xlu1 %128 }
 0x18e   :  { %v130_v62 = vrot.slane %v129_v61, 4 }
 0x190   :  { %v131_v63 = vadd.f32 %v130_v62, %v129_v61 }
 0x192   :  { %v132_v0 = vrot.slane %v131_v63, 2 }
 0x194   :  { %v133_v1 = vadd.f32 %v132_v0, %v131_v63 }
 0x196   :  { %v134_v2 = vrot.slane %v133_v1, 1 }
 0x198   :  { %v135_v3 = vadd.f32 %v134_v2, %v133_v1 }
 0x19a   :  { %156 = vpush %v135_v3 }
 0x1cb   :  { %s157_s15 = spop %156 }
 0x1cc   :  { %s137_s16 = sadd.f32 %s157_s15, %s155_s14 }
 0x1ce   :  { %139 = sst [smem:[#allocation5]] %s137_s16 }
 0x1cf   :  { %147 = dma.smem_to_hbm %s201_s17, 16, %s219_s1, [#allocation4]  }
 0x1d0   :  { %194 = dma.done.wait [#allocation4], 16  }
 0x1d1   :  { %195 = vsyncadd [#allocation4], 4294967280 }
 0x1d2   :  { %151 = sfence }
 0x1d3   :  { %152 = vsyncpa [#allocation3], 1 }
 0x1d4   :  { %153 = vsyncpa [#allocation4], 1 }

</bundles_post_ra>
